<compile_context>
chip_gen: v5e
topology: v5e:2x2
jax: 0.10.0
libtpu: 0.0.40
codegen_flags: <defaults>
</compile_context>

<pallas_src>
import jax
import jax.numpy as jnp
from jax.experimental import pallas as pl
from jax.experimental.pallas import tpu as pltpu  # noqa: F401  (see production-size note below)

# --- configuration implied by args / hps in the PyTorch module -----------------
BATCH = 2
MAX_CHAIN = 2
N_SENT = 4
MAX_SEQ_LENGTH = 8                     # self.max_seq_length
SEQ = N_SENT * MAX_SEQ_LENGTH          # tokens per chain = 32
HIDDEN = 32
VOCAB = 64
MLM_PROBABILITY = 0.15                 # self.args.mlm_probability

LANES = 128                            # TPU lane width


# --- Pallas kernel: tanh(event_embeddings * sentence_mask), lane-dense ---------
def _masked_tanh_kernel(emb_ref, mask_ref, out_ref):
    # Dense elementwise op on a lane-dense (rows, 128) slab; mask is
    # pre-broadcast in the wrapper so this is a plain vreg-wide multiply+tanh.
    out_ref[...] = jnp.tanh(emb_ref[...] * mask_ref[...])


def masked_tanh(emb, mask):
    """tanh(emb * mask[..., None]).

    emb  : (BC, R, H) float32
    mask : (BC, R)    any numeric dtype (0/1)

    Flattened to a lane-dense (rows, 128) slab and processed in ONE grid step.
    """
    bc, r, h = emb.shape
    dtype = emb.dtype
    mask_b = jnp.broadcast_to(mask.astype(dtype)[..., None], (bc, r, h))

    total = bc * r * h
    if total % LANES == 0:
        rows, lanes = total // LANES, LANES          # lane-dense: last dim = 128
    else:
        rows, lanes = bc * r, h                      # fallback (still correct)

    emb_flat = emb.reshape(rows, lanes)
    mask_flat = mask_b.reshape(rows, lanes)

    # NOTE: at production sizes (multi-MB activations) tile `rows` with a
    # "parallel" grid (e.g. 512-row blocks, last dim a multiple of 128) and set
    # pltpu.CompilerParams(vmem_limit_bytes=...) for v7x's 64 MiB VMEM.
    # At this toy size a single whole-array block is optimal.
    out_flat = pl.pallas_call(
        _masked_tanh_kernel,
        out_shape=jax.ShapeDtypeStruct((rows, lanes), dtype),
        grid=(1,),
        in_specs=[
            pl.BlockSpec((rows, lanes), lambda i: (0, 0)),
            pl.BlockSpec((rows, lanes), lambda i: (0, 0)),
        ],
        out_specs=pl.BlockSpec((rows, lanes), lambda i: (0, 0)),
    )(emb_flat, mask_flat)

    return out_flat.reshape(bc, r, h)


# --- forward pass (mirrors Bicaution.forward) ----------------------------------
def bicaution_forward(params, input_ids, end_ids, labels, length,
                      sentence_mask, attention_mask, token_input_ids, mask_key):
    batch_size = input_ids.shape[0]
    bc = batch_size * MAX_CHAIN

    # TODO(synk): Context_Encoder is not defined in the reference source; the
    # `contexts` branch has no semantics to reproduce and is omitted.

    input_ids = input_ids.reshape(bc, -1)
    attention_mask = attention_mask.reshape(bc, -1)
    token_input_ids = token_input_ids.reshape(bc, -1)
    sentence_mask = sentence_mask.reshape(bc, -1)
    end_ids = end_ids.reshape(bc, -1)

    # TODO(synk): the real event_encoder (a transformer) is not defined in the
    # reference source; a deterministic embedding-table lookup stands in as the
    # source of its last-layer hidden states.
    #
    # Downstream, only event_embeddings[:, ::MAX_SEQ_LENGTH, :] is consumed
    # (the full tanh'd tensor is dead in the reference), so the strided slice
    # is fused upstream: gather + mask + tanh only on those rows.
    sel_ids = input_ids[:, ::MAX_SEQ_LENGTH]          # (BC, N_SENT)
    sel_mask = sentence_mask[:, ::MAX_SEQ_LENGTH]     # (BC, N_SENT)
    sel_emb = params["embed"][sel_ids]                # (BC, N_SENT, HIDDEN)

    # --- Pallas hot path: tanh(emb * mask) on the surviving rows only ---
    event_new_embeddings = masked_tanh(sel_emb, sel_mask.astype(jnp.float32))

    # end_ids.unsqueeze(-1).expand(..., HIDDEN), as in the torch code
    end_ids_exp = jnp.broadcast_to(
        end_ids[..., None].astype(event_new_embeddings.dtype),
        (end_ids.shape[0], end_ids.shape[1], HIDDEN),
    )

    # np.random.binomial(1, mlm_probability) -> bernoulli; unmasked label
    # positions set to -1 (labels[~masked_indices] = -1).
    masked_indices = jax.random.bernoulli(mask_key, MLM_PROBABILITY, labels.shape)
    labels = jnp.where(masked_indices, labels, -1)

    # TODO(synk): Reasoning_chain is not defined in the reference source; the
    # tensors that would be fed to it are returned in place of final_scores.
    return event_new_embeddings, end_ids_exp, labels


if __name__ == "__main__":
    key = jax.random.PRNGKey(0)
    k_emb, k_ids, k_lab, k_tok, k_smask, k_mlm = jax.random.split(key, 6)

    # Deterministic parameters (synthetic event-encoder embedding table).
    params = {
        "embed": jax.random.normal(k_emb, (VOCAB, HIDDEN), dtype=jnp.float32) * 0.1
    }

    # Deterministic example inputs, shapes consistent with the forward().
    input_ids = jax.random.randint(k_ids, (BATCH, MAX_CHAIN, SEQ), 0, VOCAB, jnp.int32)
    token_input_ids = jax.random.randint(k_tok, (BATCH, MAX_CHAIN, SEQ), 0, VOCAB, jnp.int32)
    attention_mask = jnp.ones((BATCH, MAX_CHAIN, SEQ), dtype=jnp.int32)
    # sentence_mask: 1 where token belongs to a valid sentence, 0 elsewhere.
    sentence_mask = (
        jax.random.bernoulli(k_smask, 0.8, (BATCH, MAX_CHAIN, SEQ))
    ).astype(jnp.int32)
    # end_ids: marks sentence-end token positions.
    end_ids = jnp.zeros((BATCH, MAX_CHAIN, SEQ), dtype=jnp.int32)
    end_ids = end_ids.at[:, :, MAX_SEQ_LENGTH - 1 :: MAX_SEQ_LENGTH].set(1)
    labels = jax.random.randint(k_lab, (BATCH, MAX_CHAIN), 0, N_SENT, jnp.int32)
    length = jnp.full((BATCH,), SEQ, dtype=jnp.int32)

    ev_new, end_exp, masked_labels = bicaution_forward(
        params, input_ids, end_ids, labels, length,
        sentence_mask, attention_mask, token_input_ids, k_mlm,
    )
    jax.block_until_ready((ev_new, end_exp, masked_labels))

    # Sanity check against a pure-JAX reference of the ORIGINAL (unfused) path:
    # tanh over the full (BC, SEQ, HIDDEN) tensor then the ::MAX_SEQ_LENGTH slice.
    bc = BATCH * MAX_CHAIN
    emb_full = params["embed"][input_ids.reshape(bc, -1)]
    ref_full = jnp.tanh(
        emb_full * sentence_mask.reshape(bc, -1, 1).astype(jnp.float32)
    )
    ref_new = ref_full[:, ::MAX_SEQ_LENGTH, :]

    assert ev_new.shape == (bc, N_SENT, HIDDEN)
    assert end_exp.shape == (bc, SEQ, HIDDEN)
    assert masked_labels.shape == (BATCH, MAX_CHAIN)
    assert jnp.allclose(ev_new, ref_new, atol=1e-6)

    print("KERNEL_OK")
</pallas_src>

<mosaic_0001>
module attributes {stable_mosaic.version = 11 : i64} {
  func.func @_masked_tanh_kernel(%arg0: i32, %arg1: memref<4x128xf32, #tpu.memory_space<vmem>>, %arg2: memref<4x128xf32, #tpu.memory_space<vmem>>, %arg3: memref<4x128xf32, #tpu.memory_space<vmem>>) attributes {dimension_semantics = [#tpu.dimension_semantics<arbitrary>], iteration_bounds = array<i64: 1>, scalar_prefetch = 0 : i64, scratch_operands = 0 : i64, tpu.core_type = #tpu.core_type<tc>, window_params = [{pipeline_mode = #tpu.pipeline_mode<synchronous>, transform_indices = @transform_0, window_bounds = array<i64: 4, 128>}, {pipeline_mode = #tpu.pipeline_mode<synchronous>, transform_indices = @transform_1, window_bounds = array<i64: 4, 128>}, {pipeline_mode = #tpu.pipeline_mode<synchronous>, transform_indices = @transform_2, window_bounds = array<i64: 4, 128>}]} {
    %c0 = arith.constant 0 : index
    %c0_0 = arith.constant 0 : index
    %0 = vector.load %arg1[%c0, %c0_0] : memref<4x128xf32, #tpu.memory_space<vmem>>, vector<4x128xf32>
    %c0_1 = arith.constant 0 : index
    %c0_2 = arith.constant 0 : index
    %1 = vector.load %arg2[%c0_1, %c0_2] : memref<4x128xf32, #tpu.memory_space<vmem>>, vector<4x128xf32>
    %2 = arith.mulf %0, %1 : vector<4x128xf32>
    %3 = math.tanh %2 : vector<4x128xf32>
    %c0_3 = arith.constant 0 : index
    %c0_4 = arith.constant 0 : index
    %4 = vector.load %arg3[%c0_3, %c0_4] : memref<4x128xf32, #tpu.memory_space<vmem>>, vector<4x128xf32>
    tpu.vector_store %arg3[%c0_3, %c0_4], %3 {strides = array<i32>} : memref<4x128xf32, #tpu.memory_space<vmem>>, vector<4x128xf32>,
    return
  }
  func.func @transform_0(%arg0: i32) -> (i32, i32) {
    %c0_i32 = arith.constant 0 : i32
    %c0_i32_0 = arith.constant 0 : i32
    %c0_i32_1 = arith.constant 0 : i32
    return %c0_i32, %c0_i32_0 : i32, i32
  }
  func.func @transform_1(%arg0: i32) -> (i32, i32) {
    %c0_i32 = arith.constant 0 : i32
    %c0_i32_0 = arith.constant 0 : i32
    %c0_i32_1 = arith.constant 0 : i32
    return %c0_i32, %c0_i32_0 : i32, i32
  }
  func.func @transform_2(%arg0: i32) -> (i32, i32) {
    %c0_i32 = arith.constant 0 : i32
    %c0_i32_0 = arith.constant 0 : i32
    %c0_i32_1 = arith.constant 0 : i32
    return %c0_i32, %c0_i32_0 : i32, i32
  }
}

</mosaic_0001>

<bundles_post_ra>
// kernel: tpu_custom_call.1
= control target key start
LH: loop header
LB: loop body
LE: loop exit
PB: predicated region body
PF: predicated region fallthrough
CT: control target
= control target key end

     0   :  { %7 = vsyncpa [#allocation3], 0  ;;  %s173_s0 = inlined_call_operand.hbm [shape: f32[4,128], index: 0, kind: input, shape index: {}]   ;;  %s174_s1 = inlined_call_operand.hbm [shape: f32[4,128], index: 1, kind: input, shape index: {}]   ;;  %s175_s2 = inlined_call_operand.hbm [shape: f32[4,128], index: 2, kind: output, shape index: {}]  }
   0x1   :  { %8 = vsyncpa [#allocation6], 0 }
   0x2   :  { %9 = vsyncpa [#allocation4], 0  ;;  %s15_s11 = sshll.u32 %s173_s0, 4  ;;  %s146_s12 = smov [#allocation2]   ;;  %s16_s11 = int_to_ptr.hbm [resolvable:$true] %s15_s11 }
   0x3   :  { %s17_s13 = sshll.u32 %s146_s12, 4  ;;  %s26_s16 = sshll.u32 %s174_s1, 4  ;;  %s18_s13 = int_to_ptr.vmem [resolvable:$true] %s17_s13  ;;  %s27_s16 = int_to_ptr.hbm [resolvable:$true] %s26_s16 }
   0x4   :  { %20 = dma.hbm_to_vmem [thread:$0]  %s16_s11, 64, %s18_s13, [#allocation3]  }
   0x5   :  { %s147_s17 = smov [#allocation5]  }
   0x6   :  { %s28_s18 = sshll.u32 %s147_s17, 4  ;;  %s29_s18 = int_to_ptr.vmem [resolvable:$true] %s28_s18 }
   0x7   :  { %31 = dma.hbm_to_vmem [thread:$0]  %s27_s16, 64, %s29_s18, [#allocation6]  }
   0x8   :  { %140 = dma.done.wait [#allocation3], 64  }
   0x9   :  { %141 = vsyncadd [#allocation3], 4294967232 }
   0xa   :  { %142 = dma.done.wait [#allocation6], 64  }
   0xb   :  { %143 = vsyncadd [#allocation6], 4294967232  ;;  %v40_v0 = vld [vmem:[#allocation2] sm:$0xf]  ;;  %v41_v1 = vld [vmem:[#allocation5] sm:$0xf] }
   0xc   :  { %v42_v2 = vmul.f32 %v41_v1, %v40_v0  ;;  %s148_s0 = smov [#allocation7]   ;;  %s52_s1 = sshll.u32 %s175_s2, 4  ;;  %s53_s1 = int_to_ptr.hbm [resolvable:$true] %s52_s1 }
   0xd   :  { %s50_s19 = sshll.u32 %s148_s0, 4  ;;  %s51_s19 = int_to_ptr.vmem [resolvable:$true] %s50_s19 }
   0xe   :  { %66 = vtanh.f32 %v42_v2 }
  0x14   :  { %v67_v3 = vpop.eup %66 }
  0x15   :  { %44 = vst [vmem:[#allocation7] sm:$0xf] %v67_v3 }
  0x16   :  { %55 = dma.vmem_to_hbm [thread:$0]  %s51_s19, 64, %s53_s1, [#allocation4]  }
  0x17   :  { %144 = dma.done.wait [#allocation4], 64  }
  0x18   :  { %145 = vsyncadd [#allocation4], 4294967232 }
  0x19   :  { %60 = vsyncpa [#allocation3], 1 }
  0x1a   :  { %61 = vsyncpa [#allocation6], 1 }
  0x1b   :  { %62 = vsyncpa [#allocation4], 1 }

</bundles_post_ra>
